<compile_context>
chip_gen: v7x
topology: tpu7x:2x2x1
jax: 0.10.0
libtpu: 0.0.40
codegen_flags: <defaults>
</compile_context>

<pallas_src>
import math

import jax
import jax.numpy as jnp
import numpy as np
from jax.experimental import pallas as pl
from jax.experimental.pallas import tpu as pltpu


def _maxpool3d_kernel(x_ref, sel_ref, o_ref):
    """One grid step pools TB output depth-planes.

    x_ref  : (TB, 2, Ho, 2*W)  TB (n,c,do) plane-pairs; axis 1 = depth-pair;
                               lane axis merges (h-pair, w) -> hr*W + w.
    sel_ref: (W-1, Wo)         one-hot: sel[2*wo, wo] = 1 (even-lane pick).
    o_ref  : (TB*Ho, Wo)       full contiguous output rows.
    """
    x = x_ref[...]
    tb, _, ho, w2 = x.shape
    w = w2 // 2
    # depth-pair max: slices a major axis -> pure VPU.
    a = jnp.maximum(x[:, 0], x[:, 1])                      # (TB, Ho, 2*W)
    # h-pair max: the two contiguous lane halves.
    b = jnp.maximum(a[..., :w], a[..., w:])                # (TB, Ho, W)
    # w-pair max: each lane vs its right neighbour (valid at even lanes).
    c = jnp.maximum(b[..., : w - 1], b[..., 1:])           # (TB, Ho, W-1)
    # even-lane compaction via a single tiny one-hot matmul (MXU is idle
    # anyway; at W MACs per output the kernel stays HBM-bound).
    c2 = c.reshape(tb * ho, w - 1)                         # layout-free if Ho%8==0
    res = jnp.dot(c2, sel_ref[...], preferred_element_type=jnp.float32)
    o_ref[...] = res.astype(o_ref.dtype)


def _pick_block_planes(m, unit_bytes, ho, budget_bytes=4 << 20):
    """Pick TB = plane-pairs per grid step.

    * TB*Ho must be a multiple of 8 unless TB == m (output-block (8,128) rule,
      and a free in-kernel flatten when Ho % 8 == 0).
    * ~4 MiB of input per block: double-buffered this fits v5e's 16 MiB scoped
      VMEM default with room to spare; generous for v6e/v7x too.
    * keep >= 2 grid steps when possible (v7x megacore + pipeline overlap);
      no divisor requirement and no artificial step floor.
    """
    align = 8 // math.gcd(ho, 8)
    tb = (budget_bytes // max(unit_bytes, 1)) // align * align
    tb = max(align, tb)
    if m > align:
        half = -(-m // 2)                        # ceil(m / 2)
        half = -(-half // align) * align         # round up to alignment
        tb = min(tb, half)
    if tb >= m:
        tb = m                                   # single full-extent block
    return tb


def max_pool3d_2x2x2(x):
    """nn.MaxPool3d(kernel_size=2, stride=2) on (N, C, D, H, W)."""
    if not jnp.issubdtype(x.dtype, jnp.floating):
        raise ValueError("max_pool3d_2x2x2 only supports floating dtypes")
    N, C, D, H, W = x.shape
    Do, Ho, Wo = D // 2, H // 2, W // 2
    if min(Do, Ho, Wo) == 0:
        raise ValueError("all spatial dims must be >= 2")

    # Floor mode. Odd W is cropped for free inside the kernel (its lanes are
    # simply never selected); odd D/H need a wrapper crop (one HBM copy).
    if D % 2 or H % 2:
        x = x[:, :, : 2 * Do, : 2 * Ho, :]

    M = N * C * Do                 # output depth-planes across batch/channel
    W2 = 2 * W                     # merged (h-pair, w) lane axis
    # Free, contiguous reshape: (N, C, 2*Do, 2*Ho, W) -> (M, 2, Ho, 2*W).
    x_r = x.reshape(M, 2, Ho, W2)

    # One-hot even-lane selection matrix: sel[2*wo, wo] = 1.  Tiny (O(W*Wo));
    # constant index_map so the pipeline never re-fetches it.
    rows = np.arange(W - 1)[:, None]
    cols = np.arange(Wo)[None, :]
    sel = jnp.asarray((rows == 2 * cols).astype(x.dtype))   # (W-1, Wo)

    unit_bytes = 2 * Ho * W2 * x.dtype.itemsize
    TB = _pick_block_planes(M, unit_bytes, Ho)

    out = pl.pallas_call(
        _maxpool3d_kernel,
        out_shape=jax.ShapeDtypeStruct((M * Ho, Wo), x.dtype),
        grid=(pl.cdiv(M, TB),),                 # ragged last block is fine:
        in_specs=[                              # rows are fully independent.
            pl.BlockSpec((TB, 2, Ho, W2), lambda i: (i, 0, 0, 0)),
            pl.BlockSpec((W - 1, Wo), lambda i: (0, 0)),
        ],
        out_specs=pl.BlockSpec((TB * Ho, Wo), lambda i: (i, 0)),
        compiler_params=pltpu.CompilerParams(
            dimension_semantics=("parallel",)),
    )(x_r, sel)

    # Free reshape back to the PyTorch output layout.
    return out.reshape(N, C, Do, Ho, Wo)


# ------------------------------- reference ----------------------------------

def max_pool3d_ref(x):
    return jax.lax.reduce_window(
        x, -jnp.inf, jax.lax.max,
        window_dimensions=(1, 1, 2, 2, 2),
        window_strides=(1, 1, 2, 2, 2),
        padding="VALID")


if __name__ == "__main__":
    key = jax.random.PRNGKey(0)
    k1, k2, k3 = jax.random.split(key, 3)

    # batch=2, channels=4, spatial=16 (NCDHW, like the PyTorch module).
    x1 = jax.random.normal(k1, (2, 4, 16, 16, 16), jnp.float32)
    out1 = jax.block_until_ready(max_pool3d_2x2x2(x1))
    assert out1.shape == (2, 4, 8, 8, 8)
    np.testing.assert_allclose(np.asarray(out1), np.asarray(max_pool3d_ref(x1)),
                               atol=1e-6, rtol=1e-6)

    # non-cubic, non-power-of-two widths.
    x2 = jax.random.normal(k2, (1, 3, 8, 32, 24), jnp.float32)
    out2 = jax.block_until_ready(max_pool3d_2x2x2(x2))
    assert out2.shape == (1, 3, 4, 16, 12)
    np.testing.assert_allclose(np.asarray(out2), np.asarray(max_pool3d_ref(x2)),
                               atol=1e-6, rtol=1e-6)

    # odd H (wrapper crop), odd W (in-kernel crop), ragged grid (M=15, TB=8).
    x3 = jax.random.normal(k3, (1, 3, 10, 17, 15), jnp.float32)
    out3 = jax.block_until_ready(max_pool3d_2x2x2(x3))
    assert out3.shape == (1, 3, 5, 8, 7)
    np.testing.assert_allclose(np.asarray(out3), np.asarray(max_pool3d_ref(x3)),
                               atol=1e-6, rtol=1e-6)

    print("KERNEL_OK")
</pallas_src>

<mosaic_0001>
module attributes {stable_mosaic.version = 11 : i64} {
  func.func @_maxpool3d_kernel(%arg0: i32, %arg1: memref<32x2x8x32xf32, #tpu.memory_space<vmem>>, %arg2: memref<15x8xf32, #tpu.memory_space<vmem>>, %arg3: memref<256x8xf32, #tpu.memory_space<vmem>>) attributes {dimension_semantics = [#tpu.dimension_semantics<parallel>], iteration_bounds = array<i64: 2>, scalar_prefetch = 0 : i64, scratch_operands = 0 : i64, tpu.core_type = #tpu.core_type<tc>, window_params = [{transform_indices = @transform_0, window_bounds = array<i64: 32, 2, 8, 32>}, {pipeline_mode = #tpu.pipeline_mode<synchronous>, transform_indices = @transform_1, window_bounds = array<i64: 15, 8>}, {transform_indices = @transform_2, window_bounds = array<i64: 256, 8>}]} {
    %c0 = arith.constant 0 : index
    %c0_0 = arith.constant 0 : index
    %c0_1 = arith.constant 0 : index
    %c0_2 = arith.constant 0 : index
    %0 = vector.load %arg1[%c0, %c0_0, %c0_1, %c0_2] : memref<32x2x8x32xf32, #tpu.memory_space<vmem>>, vector<32x2x8x32xf32>
    %1 = vector.extract_strided_slice %0 {offsets = [0, 0, 0, 0], sizes = [32, 1, 8, 32], strides = [1, 1, 1, 1]} : vector<32x2x8x32xf32> to vector<32x1x8x32xf32>
    %2 = vector.shape_cast %1 : vector<32x1x8x32xf32> to vector<32x8x32xf32>
    %3 = vector.extract_strided_slice %0 {offsets = [0, 1, 0, 0], sizes = [32, 1, 8, 32], strides = [1, 1, 1, 1]} : vector<32x2x8x32xf32> to vector<32x1x8x32xf32>
    %4 = vector.shape_cast %3 : vector<32x1x8x32xf32> to vector<32x8x32xf32>
    %5 = arith.maximumf %2, %4 : vector<32x8x32xf32>
    %6 = vector.extract_strided_slice %5 {offsets = [0, 0, 0], sizes = [32, 8, 16], strides = [1, 1, 1]} : vector<32x8x32xf32> to vector<32x8x16xf32>
    %7 = vector.extract_strided_slice %5 {offsets = [0, 0, 16], sizes = [32, 8, 16], strides = [1, 1, 1]} : vector<32x8x32xf32> to vector<32x8x16xf32>
    %8 = arith.maximumf %6, %7 : vector<32x8x16xf32>
    %9 = vector.extract_strided_slice %8 {offsets = [0, 0, 0], sizes = [32, 8, 15], strides = [1, 1, 1]} : vector<32x8x16xf32> to vector<32x8x15xf32>
    %10 = vector.extract_strided_slice %8 {offsets = [0, 0, 1], sizes = [32, 8, 15], strides = [1, 1, 1]} : vector<32x8x16xf32> to vector<32x8x15xf32>
    %11 = arith.maximumf %9, %10 : vector<32x8x15xf32>
    %12 = vector.shape_cast %11 : vector<32x8x15xf32> to vector<256x15xf32>
    %c0_3 = arith.constant 0 : index
    %c0_4 = arith.constant 0 : index
    %13 = vector.load %arg2[%c0_3, %c0_4] : memref<15x8xf32, #tpu.memory_space<vmem>>, vector<15x8xf32>
    %cst = arith.constant dense<0.000000e+00> : vector<256x8xf32>
    %14 = tpu.matmul %12, %13, %cst {dimension_numbers = #tpu.dot_dimension_numbers<[1], [0], [0], [1], [0, 0, 1, 1], [], []>} : vector<256x15xf32>, vector<15x8xf32>, vector<256x8xf32> -> vector<256x8xf32>
    %c0_5 = arith.constant 0 : index
    %c0_6 = arith.constant 0 : index
    %15 = vector.load %arg3[%c0_5, %c0_6] : memref<256x8xf32, #tpu.memory_space<vmem>>, vector<256x8xf32>
    tpu.vector_store %arg3[%c0_5, %c0_6], %14 {strides = array<i32>} : memref<256x8xf32, #tpu.memory_space<vmem>>, vector<256x8xf32>,
    return
  }
  func.func @transform_0(%arg0: i32) -> (i32, i32, i32, i32) {
    %c0_i32 = arith.constant 0 : i32
    %c0_i32_0 = arith.constant 0 : i32
    %c0_i32_1 = arith.constant 0 : i32
    %c0_i32_2 = arith.constant 0 : i32
    return %arg0, %c0_i32, %c0_i32_0, %c0_i32_1 : i32, i32, i32, i32
  }
  func.func @transform_1(%arg0: i32) -> (i32, i32) {
    %c0_i32 = arith.constant 0 : i32
    %c0_i32_0 = arith.constant 0 : i32
    %c0_i32_1 = arith.constant 0 : i32
    return %c0_i32, %c0_i32_0 : i32, i32
  }
  func.func @transform_2(%arg0: i32) -> (i32, i32) {
    %c0_i32 = arith.constant 0 : i32
    %c0_i32_0 = arith.constant 0 : i32
    return %arg0, %c0_i32 : i32, i32
  }
}

</mosaic_0001>

<bundles_post_ra>
// kernel: tpu_custom_call.1
= control target key start
LH: loop header
LB: loop body
LE: loop exit
PB: predicated region body
PF: predicated region fallthrough
CT: control target
= control target key end

     0   :  { %s1160_s9 = smov 0   ;;  %s1671_s0 = inlined_call_operand.vmem [shape: f32[64,2,8,32], index: 0, kind: input, shape index: {}]   ;;  %s1672_s1 = inlined_call_operand.vmem [shape: f32[15,8], index: 1, kind: input, shape index: {}]   ;;  %s1673_s2 = inlined_call_operand.vmem [shape: f32[512,8], index: 2, kind: output, shape index: {}]  }
   0x1 LB: > { %s983_s10 = sadd.s32 4294967295, %s1140_s9   ;;  %p987_p0 = scmp.ge.s32.totalorder %s1140_s9, 1  ;;  %s1140_s9 = sphi %s1160_s9, %s12_s9  }
   0x2   : > { %p114_p1 = scmp.lt.s32.totalorder %s1140_s9, 3 }
   0x4   : > { %p115_p2 = pnand %p987_p0, %p114_p1 }
   0x5   : > { %s988_s11 = sshll.u32 (!%p115_p2), %s983_s10, 5  ;;  %s1142_s16 = smov (!%p115_p2), 112   ;;  %vm665_vm0 = vcmask (!%p115_p2), 1046528   ;;  %vm1143_vm1 = vmmov (!%p115_p2), 1   ;;  %vm568_vm3 = vcmask (!%p115_p2), 121856   ;;  %vm894_vm4 = vcmask (!%p115_p2), 64512  }
   0x6   : > { %118 = sbr.rel (%p115_p2) target bundleno = 531 (0x213), region = 28  ;;  %p138_p3 = scmp.lt.s32.totalorder (!%p115_p2), %s988_s11, 63  ;;  %vm1116_vm2 = vmpackc.low (!%p115_p2), %vm665_vm0, %vm1143_vm1 }
   0x7   : > { %s1144_s21 = smov (!%p115_p2), 127  }
   0xd   : > { %s1675_s11 = smov (!%p138_p3, %s988_s11), 63 }
   0xe   : > { %s1028_s12 = sshll.u32 %s1675_s11, 4  ;;  %s992_s22 = sshll.u32 %s1675_s11, 3 }
   0xf   : > { %s1174_s15 = scalar_lea.vmem %s1671_s0, %s1028_s12  ;;  %s1602_s25 = scalar_lea.vmem %s1673_s2, %s992_s22 }
  0x10   : > { %v150_v0 = vld [vmem:[%s1174_s15] sm:$0xff]  ;;  %v151_v1 = vld [vmem:[%s1174_s15 + $0x8] sm:$0xff]  ;;  %v152_v2 = vld [vmem:[%s1174_s15 + $0x10] sm:$0xff] }
  0x11   : > { %v1179_v3 = vmax.f32 %v150_v0, %v151_v1  ;;  %v153_v4 = vld [vmem:[%s1174_s15 + $0x18] sm:$0xff]  ;;  %v182_v5 = vld [vmem:[%s1174_s15 + $0x100] sm:$0xff]  ;;  %v183_v6 = vld [vmem:[%s1174_s15 + $0x108] sm:$0xff] }
  0x12   : > { %v1184_v7 = vmax.f32 %v152_v2, %v153_v4  ;;  %v184_v8 = vld [vmem:[%s1174_s15 + $0x110] sm:$0xff]  ;;  %v185_v9 = vld [vmem:[%s1174_s15 + $0x118] sm:$0xff]  ;;  %v1190_v10 = vmax.f32 %v182_v5, %v183_v6  ;;  %v154_v12 = vld [vmem:[%s1174_s15 + $0x20] sm:$0xff] }
  0x13   : > { %278 = vrot.lane.b32.xlu0 %v1179_v3, %s1142_s16  ;;  %v1194_v11 = vmax.f32 %v184_v8, %v185_v9  ;;  %v155_v13 = vld [vmem:[%s1174_s15 + $0x28] sm:$0xff]  ;;  %v186_v14 = vld [vmem:[%s1174_s15 + $0x120] sm:$0xff]  ;;  %v156_v18 = vld [vmem:[%s1174_s15 + $0x30] sm:$0xff] }
  0x14   : > { %280 = vrot.lane.b32.xlu1 %v1184_v7, %s1142_s16  ;;  %v187_v15 = vld [vmem:[%s1174_s15 + $0x128] sm:$0xff]  ;;  %v1202_v16 = vmax.f32 %v154_v12, %v155_v13  ;;  %v157_v19 = vld [vmem:[%s1174_s15 + $0x38] sm:$0xff]  ;;  %v188_v20 = vld [vmem:[%s1174_s15 + $0x130] sm:$0xff] }
  0x15   : > { %v1206_v17 = vmax.f32 %v186_v14, %v187_v15  ;;  %v189_v21 = vld [vmem:[%s1174_s15 + $0x138] sm:$0xff]  ;;  %v1214_v22 = vmax.f32 %v156_v18, %v157_v19  ;;  %v158_v24 = vld [vmem:[%s1174_s15 + $0x40] sm:$0xff]  ;;  %v159_v25 = vld [vmem:[%s1174_s15 + $0x48] sm:$0xff] }
  0x16   : > { %v1218_v23 = vmax.f32 %v188_v20, %v189_v21  ;;  %v190_v26 = vld [vmem:[%s1174_s15 + $0x140] sm:$0xff]  ;;  %v191_v27 = vld [vmem:[%s1174_s15 + $0x148] sm:$0xff]  ;;  %v1226_v28 = vmax.f32 %v158_v24, %v159_v25  ;;  %v160_v30 = vld [vmem:[%s1174_s15 + $0x50] sm:$0xff] }
  0x17   : > { %310 = vrot.lane.b32.xlu0 %v1190_v10, %s1142_s16  ;;  %v1230_v29 = vmax.f32 %v190_v26, %v191_v27  ;;  %v161_v31 = vld [vmem:[%s1174_s15 + $0x58] sm:$0xff]  ;;  %v192_v32 = vld [vmem:[%s1174_s15 + $0x150] sm:$0xff]  ;;  %v162_v36 = vld [vmem:[%s1174_s15 + $0x60] sm:$0xff] }
  0x18   : > { %312 = vrot.lane.b32.xlu1 %v1194_v11, %s1142_s16  ;;  %v193_v33 = vld [vmem:[%s1174_s15 + $0x158] sm:$0xff]  ;;  %v1238_v34 = vmax.f32 %v160_v30, %v161_v31  ;;  %v163_v37 = vld [vmem:[%s1174_s15 + $0x68] sm:$0xff]  ;;  %v194_v38 = vld [vmem:[%s1174_s15 + $0x160] sm:$0xff] }
  0x19   : > { %v1242_v35 = vmax.f32 %v192_v32, %v193_v33  ;;  %v195_v39 = vld [vmem:[%s1174_s15 + $0x168] sm:$0xff]  ;;  %v1250_v40 = vmax.f32 %v162_v36, %v163_v37  ;;  %v164_v42 = vld [vmem:[%s1174_s15 + $0x70] sm:$0xff]  ;;  %v165_v43 = vld [vmem:[%s1174_s15 + $0x78] sm:$0xff] }
  0x1a   : > { %v1254_v41 = vmax.f32 %v194_v38, %v195_v39  ;;  %v196_v44 = vld [vmem:[%s1174_s15 + $0x170] sm:$0xff]  ;;  %v197_v45 = vld [vmem:[%s1174_s15 + $0x178] sm:$0xff]  ;;  %v1262_v46 = vmax.f32 %v164_v42, %v165_v43  ;;  %v166_v48 = vld [vmem:[%s1174_s15 + $0x80] sm:$0xff] }
  0x1b   : > { %282 = vrot.lane.b32.xlu0 %v1202_v16, %s1142_s16  ;;  %v1266_v47 = vmax.f32 %v196_v44, %v197_v45  ;;  %v167_v49 = vld [vmem:[%s1174_s15 + $0x88] sm:$0xff]  ;;  %v198_v50 = vld [vmem:[%s1174_s15 + $0x180] sm:$0xff]  ;;  %v168_v54 = vld [vmem:[%s1174_s15 + $0x90] sm:$0xff] }
  0x1c   : > { %314 = vrot.lane.b32.xlu1 %v1206_v17, %s1142_s16  ;;  %v199_v51 = vld [vmem:[%s1174_s15 + $0x188] sm:$0xff]  ;;  %v1274_v52 = vmax.f32 %v166_v48, %v167_v49  ;;  %v169_v55 = vld [vmem:[%s1174_s15 + $0x98] sm:$0xff]  ;;  %v200_v56 = vld [vmem:[%s1174_s15 + $0x190] sm:$0xff] }
  0x1d   : > { %v1278_v53 = vmax.f32 %v198_v50, %v199_v51  ;;  %v201_v57 = vld [vmem:[%s1174_s15 + $0x198] sm:$0xff]  ;;  %v1286_v58 = vmax.f32 %v168_v54, %v169_v55  ;;  %v170_v60 = vld [vmem:[%s1174_s15 + $0xa0] sm:$0xff]  ;;  %v171_v61 = vld [vmem:[%s1174_s15 + $0xa8] sm:$0xff] }
  0x1e   : > { %v1290_v59 = vmax.f32 %v200_v56, %v201_v57  ;;  %v202_v62 = vld [vmem:[%s1174_s15 + $0x1a0] sm:$0xff]  ;;  %v203_v63 = vld [vmem:[%s1174_s15 + $0x1a8] sm:$0xff]  ;;  %v1298_v0 = vmax.f32 %v170_v60, %v171_v61  ;;  %v172_v2 = vld [vmem:[%s1174_s15 + $0xb0] sm:$0xff] }
  0x1f   : > { %284 = vrot.lane.b32.xlu0 %v1214_v22, %s1142_s16  ;;  %v1302_v1 = vmax.f32 %v202_v62, %v203_v63  ;;  %v173_v4 = vld [vmem:[%s1174_s15 + $0xb8] sm:$0xff]  ;;  %v204_v5 = vld [vmem:[%s1174_s15 + $0x1b0] sm:$0xff]  ;;  %v174_v12 = vld [vmem:[%s1174_s15 + $0xc0] sm:$0xff] }
  0x20   : > { %316 = vrot.lane.b32.xlu1 %v1218_v23, %s1142_s16  ;;  %v205_v6 = vld [vmem:[%s1174_s15 + $0x1b8] sm:$0xff]  ;;  %v1310_v8 = vmax.f32 %v172_v2, %v173_v4  ;;  %v175_v13 = vld [vmem:[%s1174_s15 + $0xc8] sm:$0xff]  ;;  %v206_v14 = vld [vmem:[%s1174_s15 + $0x1c0] sm:$0xff] }
  0x21   : > { %v1314_v9 = vmax.f32 %v204_v5, %v205_v6  ;;  %v207_v15 = vld [vmem:[%s1174_s15 + $0x1c8] sm:$0xff]  ;;  %v1322_v18 = vmax.f32 %v174_v12, %v175_v13  ;;  %v176_v20 = vld [vmem:[%s1174_s15 + $0xd0] sm:$0xff]  ;;  %v177_v21 = vld [vmem:[%s1174_s15 + $0xd8] sm:$0xff] }
  0x22   : > { %v1326_v19 = vmax.f32 %v206_v14, %v207_v15  ;;  %v208_v24 = vld [vmem:[%s1174_s15 + $0x1d0] sm:$0xff]  ;;  %v209_v25 = vld [vmem:[%s1174_s15 + $0x1d8] sm:$0xff]  ;;  %v1334_v26 = vmax.f32 %v176_v20, %v177_v21  ;;  %v178_v30 = vld [vmem:[%s1174_s15 + $0xe0] sm:$0xff] }
  0x23   : > { %286 = vrot.lane.b32.xlu0 %v1226_v28, %s1142_s16  ;;  %v1338_v27 = vmax.f32 %v208_v24, %v209_v25  ;;  %v179_v31 = vld [vmem:[%s1174_s15 + $0xe8] sm:$0xff]  ;;  %v210_v32 = vld [vmem:[%s1174_s15 + $0x1e0] sm:$0xff]  ;;  %v180_v38 = vld [vmem:[%s1174_s15 + $0xf0] sm:$0xff] }
  0x24   : > { %318 = vrot.lane.b32.xlu1 %v1230_v29, %s1142_s16  ;;  %v211_v33 = vld [vmem:[%s1174_s15 + $0x1e8] sm:$0xff]  ;;  %v1346_v36 = vmax.f32 %v178_v30, %v179_v31  ;;  %v181_v39 = vld [vmem:[%s1174_s15 + $0xf8] sm:$0xff]  ;;  %v212_v42 = vld [vmem:[%s1174_s15 + $0x1f0] sm:$0xff] }
  0x25   : > { %v1350_v37 = vmax.f32 %v210_v32, %v211_v33  ;;  %v213_v43 = vld [vmem:[%s1174_s15 + $0x1f8] sm:$0xff]  ;;  %v1358_v44 = vmax.f32 %v180_v38, %v181_v39  ;;  %v566_v48 = vld [vmem:[%s1672_s1] sm:$0xff]  ;;  %v567_v49 = vld [vmem:[%s1672_s1 + $0x8] sm:$0x7f] }
  0x26   : > { %v1362_v45 = vmax.f32 %v212_v42, %v213_v43  ;;  %v1115_v50 = vpack.c.bf16 %v567_v49, %v566_v48 }
  0x27   : > { %288 = vrot.lane.b32.xlu0 %v1238_v34, %s1142_s16 }
  0x28   : > { %320 = vrot.lane.b32.xlu1 %v1242_v35, %s1142_s16  ;;  %1117 = vmatprep.subr.msk.bf16.mxu0 %vm1116_vm2, %v1115_v50 }
  0x29   : > { %1121 = vmatprep.subr.msk.bf16.mxu1 %vm1116_vm2, %v1115_v50  ;;  %1120 = vmatpush3.bf16.msk.msra.mxu0 %vm1116_vm2, %v1115_v50 }
  0x2a   : > { %1122 = vmatpush3.bf16.msk.msra.mxu1 %vm1116_vm2, %v1115_v50 }
  0x2b   : > { %290 = vrot.lane.b32.xlu0 %v1250_v40, %s1142_s16 }
  0x2c   : > { %322 = vrot.lane.b32.xlu1 %v1254_v41, %s1142_s16 }
  0x2f   : > { %292 = vrot.lane.b32.xlu0 %v1262_v46, %s1142_s16 }
  0x30   : > { %324 = vrot.lane.b32.xlu1 %v1266_v47, %s1142_s16 }
  0x33   : > { %294 = vrot.lane.b32.xlu0 %v1274_v52, %s1142_s16 }
  0x34   : > { %326 = vrot.lane.b32.xlu1 %v1278_v53, %s1142_s16 }
  0x37   : > { %296 = vrot.lane.b32.xlu0 %v1286_v58, %s1142_s16 }
  0x38   : > { %328 = vrot.lane.b32.xlu1 %v1290_v59, %s1142_s16 }
  0x3b   : > { %298 = vrot.lane.b32.xlu0 %v1298_v0, %s1142_s16 }
  0x3c   : > { %330 = vrot.lane.b32.xlu1 %v1302_v1, %s1142_s16 }
  0x3f   : > { %300 = vrot.lane.b32.xlu0 %v1310_v8, %s1142_s16 }
  0x40   : > { %332 = vrot.lane.b32.xlu1 %v1314_v9, %s1142_s16 }
  0x43   : > { %302 = vrot.lane.b32.xlu0 %v1322_v18, %s1142_s16 }
  0x44   : > { %334 = vrot.lane.b32.xlu1 %v1326_v19, %s1142_s16 }
  0x47   : > { %304 = vrot.lane.b32.xlu0 %v1334_v26, %s1142_s16 }
  0x48   : > { %336 = vrot.lane.b32.xlu1 %v1338_v27, %s1142_s16 }
  0x4b   : > { %306 = vrot.lane.b32.xlu0 %v1346_v36, %s1142_s16 }
  0x4c   : > { %338 = vrot.lane.b32.xlu1 %v1350_v37, %s1142_s16 }
  0x4f   : > { %308 = vrot.lane.b32.xlu0 %v1358_v44, %s1142_s16 }
  0x50   : > { %340 = vrot.lane.b32.xlu1 %v1362_v45, %s1142_s16 }
  0x85   : > { %v279_v51 = vpop.permute.xlu0 %278 }
  0x86   : > { %v1375_v54 = vmax.f32 %v1179_v3, %v279_v51  ;;  %v281_v55 = vpop.permute.xlu1 %280 }
  0x87   : > { %v1380_v56 = vmax.f32 %v1184_v7, %v281_v55 }
  0x88   : > { %438 = vrot.lane.b32.xlu0 %v1375_v54, %s1144_s21 }
  0x89   : > { %v311_v57 = vpop.permute.xlu0 %310 }
  0x8a   : > { %v1383_v60 = vmax.f32 %v1190_v10, %v311_v57  ;;  %v313_v61 = vpop.permute.xlu1 %312 }
  0x8b   : > { %v1390_v3 = vmax.f32 %v1194_v11, %v313_v61 }
  0x8c   : > { %440 = vrot.lane.b32.xlu0 %v1380_v56, %s1144_s21  ;;  %470 = vrot.lane.b32.xlu1 %v1383_v60, %s1144_s21 }
  0x8d   : > { %v283_v62 = vpop.permute.xlu0 %282 }
  0x8e   : > { %v1393_v63 = vmax.f32 %v1202_v16, %v283_v62  ;;  %v315_v7 = vpop.permute.xlu1 %314 }
  0x8f   : > { %v1400_v10 = vmax.f32 %v1206_v17, %v315_v7 }
  0x90   : > { %472 = vrot.lane.b32.xlu1 %v1390_v3, %s1144_s21  ;;  %442 = vrot.lane.b32.xlu0 %v1393_v63, %s1144_s21 }
  0x91   : > { %v285_v2 = vpop.permute.xlu0 %284 }
  0x92   : > { %v1403_v4 = vmax.f32 %v1214_v22, %v285_v2  ;;  %v317_v11 = vpop.permute.xlu1 %316 }
  0x93   : > { %v1410_v16 = vmax.f32 %v1218_v23, %v317_v11 }
  0x94   : > { %474 = vrot.lane.b32.xlu1 %v1400_v10, %s1144_s21  ;;  %444 = vrot.lane.b32.xlu0 %v1403_v4, %s1144_s21 }
  0x95   : > { %v287_v5 = vpop.permute.xlu0 %286 }
  0x96   : > { %v1413_v6 = vmax.f32 %v1226_v28, %v287_v5  ;;  %v319_v17 = vpop.permute.xlu1 %318 }
  0x97   : > { %v1420_v22 = vmax.f32 %v1230_v29, %v319_v17 }
  0x98   : > { %476 = vrot.lane.b32.xlu1 %v1410_v16, %s1144_s21  ;;  %446 = vrot.lane.b32.xlu0 %v1413_v6, %s1144_s21 }
  0x99   : > { %v289_v12 = vpop.permute.xlu0 %288 }
  0x9a   : > { %v1423_v13 = vmax.f32 %v1238_v34, %v289_v12  ;;  %v321_v23 = vpop.permute.xlu1 %320 }
  0x9b   : > { %v1430_v28 = vmax.f32 %v1242_v35, %v321_v23 }
  0x9c   : > { %478 = vrot.lane.b32.xlu1 %v1420_v22, %s1144_s21  ;;  %448 = vrot.lane.b32.xlu0 %v1423_v13, %s1144_s21 }
  0x9d   : > { %v291_v14 = vpop.permute.xlu0 %290 }
  0x9e   : > { %v1433_v15 = vmax.f32 %v1250_v40, %v291_v14  ;;  %v323_v29 = vpop.permute.xlu1 %322 }
  0x9f   : > { %v1440_v34 = vmax.f32 %v1254_v41, %v323_v29 }
  0xa0   : > { %480 = vrot.lane.b32.xlu1 %v1430_v28, %s1144_s21  ;;  %450 = vrot.lane.b32.xlu0 %v1433_v15, %s1144_s21 }
  0xa1   : > { %v293_v20 = vpop.permute.xlu0 %292 }
  0xa2   : > { %v1443_v21 = vmax.f32 %v1262_v46, %v293_v20  ;;  %v325_v35 = vpop.permute.xlu1 %324 }
  0xa3   : > { %v1450_v40 = vmax.f32 %v1266_v47, %v325_v35 }
  0xa4   : > { %482 = vrot.lane.b32.xlu1 %v1440_v34, %s1144_s21  ;;  %452 = vrot.lane.b32.xlu0 %v1443_v21, %s1144_s21 }
  0xa5   : > { %v295_v24 = vpop.permute.xlu0 %294 }
  0xa6   : > { %v1453_v25 = vmax.f32 %v1274_v52, %v295_v24  ;;  %v327_v41 = vpop.permute.xlu1 %326 }
  0xa7   : > { %v1460_v46 = vmax.f32 %v1278_v53, %v327_v41 }
  0xa8   : > { %484 = vrot.lane.b32.xlu1 %v1450_v40, %s1144_s21  ;;  %454 = vrot.lane.b32.xlu0 %v1453_v25, %s1144_s21 }
  0xa9   : > { %v297_v30 = vpop.permute.xlu0 %296 }
  0xaa   : > { %v1463_v31 = vmax.f32 %v1286_v58, %v297_v30  ;;  %v329_v47 = vpop.permute.xlu1 %328 }
  0xab   : > { %v1470_v52 = vmax.f32 %v1290_v59, %v329_v47 }
  0xac   : > { %486 = vrot.lane.b32.xlu1 %v1460_v46, %s1144_s21  ;;  %456 = vrot.lane.b32.xlu0 %v1463_v31, %s1144_s21 }
  0xad   : > { %v299_v32 = vpop.permute.xlu0 %298 }
  0xae   : > { %v1473_v33 = vmax.f32 %v1298_v0, %v299_v32  ;;  %v331_v53 = vpop.permute.xlu1 %330 }
  0xaf   : > { %v1480_v58 = vmax.f32 %v1302_v1, %v331_v53 }
  0xb0   : > { %488 = vrot.lane.b32.xlu1 %v1470_v52, %s1144_s21  ;;  %458 = vrot.lane.b32.xlu0 %v1473_v33, %s1144_s21 }
  0xb1   : > { %v301_v38 = vpop.permute.xlu0 %300 }
  0xb2   : > { %v1483_v39 = vmax.f32 %v1310_v8, %v301_v38  ;;  %v333_v59 = vpop.permute.xlu1 %332 }
  0xb3   : > { %v1490_v0 = vmax.f32 %v1314_v9, %v333_v59 }
  0xb4   : > { %490 = vrot.lane.b32.xlu1 %v1480_v58, %s1144_s21  ;;  %460 = vrot.lane.b32.xlu0 %v1483_v39, %s1144_s21 }
  0xb5   : > { %v303_v42 = vpop.permute.xlu0 %302 }
  0xb6   : > { %v1493_v43 = vmax.f32 %v1322_v18, %v303_v42  ;;  %v335_v1 = vpop.permute.xlu1 %334 }
  0xb7   : > { %v1500_v8 = vmax.f32 %v1326_v19, %v335_v1 }
  0xb8   : > { %492 = vrot.lane.b32.xlu1 %v1490_v0, %s1144_s21  ;;  %462 = vrot.lane.b32.xlu0 %v1493_v43, %s1144_s21 }
  0xb9   : > { %v305_v48 = vpop.permute.xlu0 %304 }
  0xba   : > { %v1503_v49 = vmax.f32 %v1334_v26, %v305_v48  ;;  %v337_v9 = vpop.permute.xlu1 %336 }
  0xbb   : > { %v1510_v18 = vmax.f32 %v1338_v27, %v337_v9 }
  0xbc   : > { %494 = vrot.lane.b32.xlu1 %v1500_v8, %s1144_s21  ;;  %464 = vrot.lane.b32.xlu0 %v1503_v49, %s1144_s21 }
  0xbd   : > { %v307_v50 = vpop.permute.xlu0 %306 }
  0xbe   : > { %v1513_v51 = vmax.f32 %v1346_v36, %v307_v50  ;;  %v339_v19 = vpop.permute.xlu1 %338 }
  0xbf   : > { %v1520_v26 = vmax.f32 %v1350_v37, %v339_v19 }
  0xc0   : > { %496 = vrot.lane.b32.xlu1 %v1510_v18, %s1144_s21  ;;  %466 = vrot.lane.b32.xlu0 %v1513_v51, %s1144_s21 }
  0xc1   : > { %v309_v55 = vpop.permute.xlu0 %308 }
  0xc2   : > { %v1523_v57 = vmax.f32 %v1358_v44, %v309_v55  ;;  %v341_v27 = vpop.permute.xlu1 %340 }
  0xc3   : > { %v1530_v36 = vmax.f32 %v1362_v45, %v341_v27 }
  0xc4   : > { %498 = vrot.lane.b32.xlu1 %v1520_v26, %s1144_s21  ;;  %468 = vrot.lane.b32.xlu0 %v1523_v57, %s1144_s21 }
  0xc8   : > { %500 = vrot.lane.b32.xlu1 %v1530_v36, %s1144_s21 }
  0xfa   : > { %v439_v61 = vpop.permute.xlu0 %438 }
  0xfb   : > { %v534_v37 = vmax.f32 %v1375_v54, %v439_v61 }
  0xfd   : > { %1067 = vmatprep.mubr.msk.f32.mxu0 %vm568_vm3, %v534_v37 }
  0xfe   : > { %v471_v44 = vpop.permute.xlu1 %470  ;;  %v441_v62 = vpop.permute.xlu0 %440 }
  0xff   : > { %v550_v7 = vmax.f32 %v1383_v60, %v471_v44  ;;  %v535_v2 = vmax.f32 %v1380_v56, %v441_v62 }
 0x101   : > { %1068 = vmatmul.mubr.msk.f32.vlgmr.msra.gmra.mrb[0].mxu0 %vm568_vm3, %v535_v2  ;;  %1091 = vmatprep.mubr.msk.f32.mxu1 %vm568_vm3, %v550_v7 }
 0x102   : > { %v473_v45 = vpop.permute.xlu1 %472  ;;  %v443_v11 = vpop.permute.xlu0 %442 }
 0x103   : > { %v551_v5 = vmax.f32 %v1390_v3, %v473_v45  ;;  %v536_v17 = vmax.f32 %v1393_v63, %v443_v11 }
 0x105   : > { %1070 = vmatprep.mubr.msk.f32.mxu0 %vm568_vm3, %v536_v17  ;;  %1092 = vmatmul.mubr.msk.f32.vlgmr.msra.gmra.mrb[0].mxu1 %vm568_vm3, %v551_v5 }
 0x106   : > { %v475_v54 = vpop.permute.xlu1 %474  ;;  %v445_v12 = vpop.permute.xlu0 %444 }
 0x107   : > { %v552_v60 = vmax.f32 %v1400_v10, %v475_v54  ;;  %v537_v56 = vmax.f32 %v1403_v4, %v445_v12 }
 0x109   : > { %1071 = vmatmul.mubr.msk.f32.gmra.mrb[2].mxu0 %vm568_vm3, %v537_v56  ;;  %1094 = vmatprep.mubr.msk.f32.mxu1 %vm568_vm3, %v552_v60 }
 0x10a   : > { %v477_v23 = vpop.permute.xlu1 %476  ;;  %v447_v14 = vpop.permute.xlu0 %446 }
 0x10b   : > { %v553_v3 = vmax.f32 %v1410_v16, %v477_v23  ;;  %v538_v63 = vmax.f32 %v1413_v6, %v447_v14 }
 0x10d   : > { %1073 = vmatprep.mubr.msk.f32.mxu0 %vm568_vm3, %v538_v63  ;;  %1095 = vmatmul.mubr.msk.f32.gmra.mrb[2].mxu1 %vm568_vm3, %v553_v3 }
 0x10e   : > { %v479_v29 = vpop.permute.xlu1 %478  ;;  %v449_v20 = vpop.permute.xlu0 %448 }
 0x10f   : > { %v554_v10 = vmax.f32 %v1420_v22, %v479_v29  ;;  %v539_v4 = vmax.f32 %v1423_v13, %v449_v20 }
 0x111   : > { %1074 = vmatmul.mubr.msk.f32.gmra.mrb[4].mxu0 %vm568_vm3, %v539_v4  ;;  %1097 = vmatprep.mubr.msk.f32.mxu1 %vm568_vm3, %v554_v10 }
 0x112   : > { %v481_v35 = vpop.permute.xlu1 %480  ;;  %v451_v24 = vpop.permute.xlu0 %450 }
 0x113   : > { %v555_v16 = vmax.f32 %v1430_v28, %v481_v35  ;;  %v540_v6 = vmax.f32 %v1433_v15, %v451_v24 }
 0x115   : > { %1076 = vmatprep.mubr.msk.f32.mxu0 %vm568_vm3, %v540_v6  ;;  %1098 = vmatmul.mubr.msk.f32.gmra.mrb[4].mxu1 %vm568_vm3, %v555_v16 }
 0x116   : > { %v483_v41 = vpop.permute.xlu1 %482  ;;  %v453_v30 = vpop.permute.xlu0 %452 }
 0x117   : > { %v556_v22 = vmax.f32 %v1440_v34, %v483_v41  ;;  %v541_v13 = vmax.f32 %v1443_v21, %v453_v30 }
 0x119   : > { %1077 = vmatmul.mubr.msk.f32.gmra.mrb[6].mxu0 %vm568_vm3, %v541_v13  ;;  %1100 = vmatprep.mubr.msk.f32.mxu1 %vm568_vm3, %v556_v22 }
 0x11a   : > { %v485_v47 = vpop.permute.xlu1 %484  ;;  %v455_v32 = vpop.permute.xlu0 %454 }
 0x11b   : > { %v557_v28 = vmax.f32 %v1450_v40, %v485_v47  ;;  %v542_v15 = vmax.f32 %v1453_v25, %v455_v32 }
 0x11d   : > { %1079 = vmatprep.mubr.msk.f32.mxu0 %vm568_vm3, %v542_v15  ;;  %1101 = vmatmul.mubr.msk.f32.gmra.mrb[6].mxu1 %vm568_vm3, %v557_v28 }
 0x11e   : > { %v487_v53 = vpop.permute.xlu1 %486  ;;  %v457_v38 = vpop.permute.xlu0 %456 }
 0x11f   : > { %v558_v34 = vmax.f32 %v1460_v46, %v487_v53  ;;  %v543_v21 = vmax.f32 %v1463_v31, %v457_v38 }
 0x121   : > { %1080 = vmatmul.mubr.msk.f32.gmra.mrb[8].mxu0 %vm568_vm3, %v543_v21  ;;  %1103 = vmatprep.mubr.msk.f32.mxu1 %vm568_vm3, %v558_v34 }
 0x122   : > { %v489_v59 = vpop.permute.xlu1 %488  ;;  %v459_v42 = vpop.permute.xlu0 %458 }
 0x123   : > { %v559_v40 = vmax.f32 %v1470_v52, %v489_v59  ;;  %v544_v25 = vmax.f32 %v1473_v33, %v459_v42 }
 0x125   : > { %1082 = vmatprep.mubr.msk.f32.mxu0 %vm568_vm3, %v544_v25  ;;  %1104 = vmatmul.mubr.msk.f32.gmra.mrb[8].mxu1 %vm568_vm3, %v559_v40 }
 0x126   : > { %v491_v1 = vpop.permute.xlu1 %490  ;;  %v461_v48 = vpop.permute.xlu0 %460 }
 0x127   : > { %v560_v46 = vmax.f32 %v1480_v58, %v491_v1  ;;  %v545_v31 = vmax.f32 %v1483_v39, %v461_v48 }
 0x129   : > { %1083 = vmatmul.mubr.msk.f32.gmra.mrb[10].mxu0 %vm568_vm3, %v545_v31  ;;  %1106 = vmatprep.mubr.msk.f32.mxu1 %vm568_vm3, %v560_v46 }
 0x12a   : > { %v493_v9 = vpop.permute.xlu1 %492  ;;  %v463_v50 = vpop.permute.xlu0 %462 }
 0x12b   : > { %v561_v52 = vmax.f32 %v1490_v0, %v493_v9  ;;  %v546_v33 = vmax.f32 %v1493_v43, %v463_v50 }
 0x12d   : > { %1085 = vmatprep.mubr.msk.f32.mxu0 %vm568_vm3, %v546_v33  ;;  %1107 = vmatmul.mubr.msk.f32.gmra.mrb[10].mxu1 %vm568_vm3, %v561_v52 }
 0x12e   : > { %v495_v19 = vpop.permute.xlu1 %494  ;;  %v465_v55 = vpop.permute.xlu0 %464 }
 0x12f   : > { %v562_v58 = vmax.f32 %v1500_v8, %v495_v19  ;;  %v547_v39 = vmax.f32 %v1503_v49, %v465_v55 }
 0x131   : > { %1086 = vmatmul.mubr.msk.f32.gmra.mrb[12].mxu0 %vm568_vm3, %v547_v39  ;;  %1109 = vmatprep.mubr.msk.f32.mxu1 %vm568_vm3, %v562_v58 }
 0x132   : > { %v497_v27 = vpop.permute.xlu1 %496  ;;  %v467_v61 = vpop.permute.xlu0 %466 }
 0x133   : > { %v563_v0 = vmax.f32 %v1510_v18, %v497_v27  ;;  %v548_v43 = vmax.f32 %v1513_v51, %v467_v61 }
 0x135   : > { %1088 = vmatprep.mubr.msk.f32.mxu0 %vm568_vm3, %v548_v43  ;;  %1110 = vmatmul.mubr.msk.f32.gmra.mrb[12].mxu1 %vm568_vm3, %v563_v0 }
 0x136   : > { %v499_v37 = vpop.permute.xlu1 %498  ;;  %v469_v44 = vpop.permute.xlu0 %468 }
 0x137   : > { %v564_v8 = vmax.f32 %v1520_v26, %v499_v37  ;;  %v549_v49 = vmax.f32 %v1523_v57, %v469_v44 }
 0x139   : > { %1089 = vmatmul.mubr.msk.f32.gmra.mrb[14].mxu0 %vm568_vm3, %v549_v49  ;;  %1112 = vmatprep.mubr.msk.f32.mxu1 %vm568_vm3, %v564_v8 }
 0x13a   : > { %v501_v62 = vpop.permute.xlu1 %500 }
 0x13b   : > { %v565_v7 = vmax.f32 %v1530_v36, %v501_v62 }
 0x13d   : > { %1113 = vmatmul.mubr.msk.f32.gmra.mrb[14].mxu1 %vm568_vm3, %v565_v7 }
 0x1d4   : > { %v1069_v18 = vpop.f32.mrb[0].mxu0 }
 0x1d5   : > { %896 = vst.msk [vmem:[%s1602_s25 + $0x8] sm:$0xff] %vm894_vm4, %v1069_v18  ;;  %v735_v51 = vpop.f32.mrb[1].mxu0 }
 0x1d6   : > { %895 = vst.msk [vmem:[%s1602_s25] sm:$0xff] %vm894_vm4, %v735_v51 }
 0x1d8   : > { %v1093_v26 = vpop.f32.mrb[0].mxu1 }
 0x1d9   : > { %912 = vst.msk [vmem:[%s1602_s25 + $0x88] sm:$0xff] %vm894_vm4, %v1093_v26  ;;  %v815_v57 = vpop.f32.mrb[1].mxu1 }
 0x1da   : > { %911 = vst.msk [vmem:[%s1602_s25 + $0x80] sm:$0xff] %vm894_vm4, %v815_v57 }
 0x1dc   : > { %v1072_v36 = vpop.f32.mrb[2].mxu0 }
 0x1dd   : > { %898 = vst.msk [vmem:[%s1602_s25 + $0x18] sm:$0xff] %vm894_vm4, %v1072_v36  ;;  %v745_v2 = vpop.f32.mrb[3].mxu0 }
 0x1de   : > { %897 = vst.msk [vmem:[%s1602_s25 + $0x10] sm:$0xff] %vm894_vm4, %v745_v2 }
 0x1e0   : > { %v1096_v45 = vpop.f32.mrb[2].mxu1 }
 0x1e1   : > { %914 = vst.msk [vmem:[%s1602_s25 + $0x98] sm:$0xff] %vm894_vm4, %v1096_v45  ;;  %v825_v11 = vpop.f32.mrb[3].mxu1 }
 0x1e2   : > { %913 = vst.msk [vmem:[%s1602_s25 + $0x90] sm:$0xff] %vm894_vm4, %v825_v11 }
 0x1e4   : > { %v1075_v5 = vpop.f32.mrb[4].mxu0 }
 0x1e5   : > { %900 = vst.msk [vmem:[%s1602_s25 + $0x28] sm:$0xff] %vm894_vm4, %v1075_v5  ;;  %v755_v17 = vpop.f32.mrb[5].mxu0 }
 0x1e6   : > { %899 = vst.msk [vmem:[%s1602_s25 + $0x20] sm:$0xff] %vm894_vm4, %v755_v17 }
 0x1e8   : > { %v1099_v54 = vpop.f32.mrb[4].mxu1 }
 0x1e9   : > { %916 = vst.msk [vmem:[%s1602_s25 + $0xa8] sm:$0xff] %vm894_vm4, %v1099_v54  ;;  %v835_v12 = vpop.f32.mrb[5].mxu1 }
 0x1ea   : > { %915 = vst.msk [vmem:[%s1602_s25 + $0xa0] sm:$0xff] %vm894_vm4, %v835_v12 }
 0x1ec   : > { %v1078_v60 = vpop.f32.mrb[6].mxu0 }
 0x1ed   : > { %902 = vst.msk [vmem:[%s1602_s25 + $0x38] sm:$0xff] %vm894_vm4, %v1078_v60  ;;  %v765_v56 = vpop.f32.mrb[7].mxu0 }
 0x1ee   : > { %901 = vst.msk [vmem:[%s1602_s25 + $0x30] sm:$0xff] %vm894_vm4, %v765_v56 }
 0x1f0   : > { %v1102_v23 = vpop.f32.mrb[6].mxu1 }
 0x1f1   : > { %918 = vst.msk [vmem:[%s1602_s25 + $0xb8] sm:$0xff] %vm894_vm4, %v1102_v23  ;;  %v845_v14 = vpop.f32.mrb[7].mxu1 }
 0x1f2   : > { %917 = vst.msk [vmem:[%s1602_s25 + $0xb0] sm:$0xff] %vm894_vm4, %v845_v14 }
 0x1f4   : > { %v1081_v3 = vpop.f32.mrb[8].mxu0 }
 0x1f5   : > { %904 = vst.msk [vmem:[%s1602_s25 + $0x48] sm:$0xff] %vm894_vm4, %v1081_v3  ;;  %v775_v63 = vpop.f32.mrb[9].mxu0 }
 0x1f6   : > { %903 = vst.msk [vmem:[%s1602_s25 + $0x40] sm:$0xff] %vm894_vm4, %v775_v63 }
 0x1f8   : > { %v1105_v29 = vpop.f32.mrb[8].mxu1 }
 0x1f9   : > { %920 = vst.msk [vmem:[%s1602_s25 + $0xc8] sm:$0xff] %vm894_vm4, %v1105_v29  ;;  %v855_v20 = vpop.f32.mrb[9].mxu1 }
 0x1fa   : > { %919 = vst.msk [vmem:[%s1602_s25 + $0xc0] sm:$0xff] %vm894_vm4, %v855_v20 }
 0x1fc   : > { %v1084_v10 = vpop.f32.mrb[10].mxu0 }
 0x1fd   : > { %906 = vst.msk [vmem:[%s1602_s25 + $0x58] sm:$0xff] %vm894_vm4, %v1084_v10  ;;  %v785_v4 = vpop.f32.mrb[11].mxu0 }
 0x1fe   : > { %905 = vst.msk [vmem:[%s1602_s25 + $0x50] sm:$0xff] %vm894_vm4, %v785_v4 }
 0x200   : > { %v1108_v35 = vpop.f32.mrb[10].mxu1 }
 0x201   : > { %922 = vst.msk [vmem:[%s1602_s25 + $0xd8] sm:$0xff] %vm894_vm4, %v1108_v35  ;;  %v865_v24 = vpop.f32.mrb[11].mxu1 }
 0x202   : > { %921 = vst.msk [vmem:[%s1602_s25 + $0xd0] sm:$0xff] %vm894_vm4, %v865_v24 }
 0x204   : > { %v1087_v16 = vpop.f32.mrb[12].mxu0 }
 0x205   : > { %908 = vst.msk [vmem:[%s1602_s25 + $0x68] sm:$0xff] %vm894_vm4, %v1087_v16  ;;  %v795_v6 = vpop.f32.mrb[13].mxu0 }
 0x206   : > { %907 = vst.msk [vmem:[%s1602_s25 + $0x60] sm:$0xff] %vm894_vm4, %v795_v6 }
 0x208   : > { %v1111_v41 = vpop.f32.mrb[12].mxu1 }
 0x209   : > { %924 = vst.msk [vmem:[%s1602_s25 + $0xe8] sm:$0xff] %vm894_vm4, %v1111_v41  ;;  %v875_v30 = vpop.f32.mrb[13].mxu1 }
 0x20a   : > { %923 = vst.msk [vmem:[%s1602_s25 + $0xe0] sm:$0xff] %vm894_vm4, %v875_v30 }
 0x20c   : > { %v1090_v22 = vpop.f32.mrb[14].mxu0 }
 0x20d   : > { %910 = vst.msk [vmem:[%s1602_s25 + $0x78] sm:$0xff] %vm894_vm4, %v1090_v22  ;;  %v805_v13 = vpop.f32.mrb[15].mxu0 }
 0x20e   : > { %909 = vst.msk [vmem:[%s1602_s25 + $0x70] sm:$0xff] %vm894_vm4, %v805_v13 }
 0x210   : > { %v1114_v47 = vpop.f32.mrb[14].mxu1 }
 0x211   : > { %926 = vst.msk [vmem:[%s1602_s25 + $0xf8] sm:$0xff] %vm894_vm4, %v1114_v47  ;;  %v885_v32 = vpop.f32.mrb[15].mxu1 }
 0x212   : > { %925 = vst.msk [vmem:[%s1602_s25 + $0xf0] sm:$0xff] %vm894_vm4, %v885_v32 }
 0x213 PF: > { %s12_s9 = sadd.s32 1, %s1140_s9  }
 0x214   : > { %p9_p4 = scmp.ge.s32.totalorder %s12_s9, 4  }
 0x216   :  { %11 = sbr.rel (!%p9_p4) target bundleno = 1 (0x1), region = 58 }

</bundles_post_ra>
